<compile_context>
chip_gen: v6e
topology: v6e:2x2x1
jax: 0.10.0
libtpu: 0.0.40
codegen_flags: <defaults>
</compile_context>

<pallas_src>
import jax
import jax.numpy as jnp
from jax.experimental import pallas as pl
from jax.experimental.pallas import tpu as pltpu

ALPHA = 0.25
GAMMA = 2


def _round_up(x, m):
    return (x + m - 1) // m * m


def _chip_config():
    """Per-generation row-tile cap / VMEM budget (conservative if unknown)."""
    kind = ""
    try:
        kind = jax.devices()[0].device_kind.lower()
    except Exception:
        pass
    if "v6" in kind or "v7" in kind:
        # v6e: 32 MiB scoped default / 128 MiB physical. v7x: 32 / 64 MiB.
        # TR<=1024 keeps double-buffered in+out streams at <= ~24 MiB.
        return {"tr_max": 1024, "vmem_limit": 32 << 20, "budget": 24 << 20}
    # v5e (16 MiB scoped default) / unknown: smaller tile, raise limit explicitly.
    return {"tr_max": 512, "vmem_limit": 28 << 20, "budget": 16 << 20}


def focal_multilabel_kernel(pred_ref, target_ref, out_ref):
    # Widen pred inside the kernel (free VPU op; inputs stream at native width).
    p = pred_ref[...].astype(jnp.float32)
    # PyTorch does target.long() before scatter_: positive iff int(target) == 1.
    is_pos = target_ref[...].astype(jnp.int32) == 1

    # p_t = pred if target==1 else (1 - pred), clamped to [1e-4, 1].
    p_t = jnp.where(is_pos, p, 1.0 - p)
    p_t = jnp.clip(p_t, 0.0001, 1.0)
    log_p = jnp.log(p_t)                                     # EUP

    a_t = jnp.where(is_pos, jnp.float32(ALPHA), jnp.float32(1.0 - ALPHA))

    one_minus = 1.0 - p_t
    if isinstance(GAMMA, int) and GAMMA >= 1:
        # Integer gamma -> repeated multiply (VPU only; never pow = exp+log on EUP).
        focal = one_minus
        for _ in range(GAMMA - 1):
            focal = focal * one_minus
    else:
        focal = one_minus ** GAMMA

    out_ref[...] = (-a_t * focal * log_p).astype(out_ref.dtype)


def focal_loss_multilabel(pred, target):
    """pred, target: same shape (B, L). Returns elementwise focal loss in pred.dtype."""
    assert pred.shape == target.shape
    orig_shape = pred.shape
    N = int(pred.size)
    out_dtype = pred.dtype if jnp.issubdtype(pred.dtype, jnp.floating) else jnp.float32

    # ---- pick a 2-D view with NO pad / slice / extra HBM pass ----
    rows_cols = None
    for W in (1024, 512, 384, 256, 128):     # lane-dense widths (multiples of 128)
        if N >= W and N % W == 0:
            rows_cols = (N // W, W)          # free row-major reshape (view)
            break
    if rows_cols is None:
        if pred.ndim >= 2:
            rows_cols = (N // orig_shape[-1], orig_shape[-1])  # native layout
        else:
            rows_cols = (1, N)
    R, C = rows_cols
    p2 = pred.reshape(R, C)
    t2 = target.reshape(R, C)

    # ---- row tile: VMEM budget + >=4 grid steps for v7x megacore sharding ----
    cfg = _chip_config()
    elem_bytes = (p2.dtype.itemsize + t2.dtype.itemsize
                  + jnp.dtype(out_dtype).itemsize)
    row_bytes = C * elem_bytes
    tr_budget = max(8, (cfg["budget"] // (2 * row_bytes)) // 8 * 8)  # dbl-buffered
    tr_steps = _round_up(pl.cdiv(R, 4), 8)   # aim for >= 4 grid steps
    if R <= 8:
        TR = R                               # block == full dim -> always legal
    else:
        TR = max(8, min(cfg["tr_max"], tr_budget, tr_steps))
    grid = (pl.cdiv(R, TR),)                 # ragged last block handled by Pallas

    out2 = pl.pallas_call(
        focal_multilabel_kernel,
        out_shape=jax.ShapeDtypeStruct((R, C), out_dtype),
        grid_spec=pl.GridSpec(
            grid=grid,
            in_specs=[
                pl.BlockSpec((TR, C), lambda i: (i, 0)),
                pl.BlockSpec((TR, C), lambda i: (i, 0)),
            ],
            out_specs=pl.BlockSpec((TR, C), lambda i: (i, 0)),
        ),
        compiler_params=pltpu.CompilerParams(
            dimension_semantics=("parallel",),        # megacore sharding on v7x
            vmem_limit_bytes=cfg["vmem_limit"]),
        cost_estimate=pl.CostEstimate(
            flops=8 * N,
            transcendentals=N,                        # jnp.log
            bytes_accessed=N * elem_bytes),
    )(p2, t2)

    return out2.reshape(orig_shape)


def focal_loss_multilabel_ref(pred, target):
    """Pure-JAX reference mirroring the PyTorch code."""
    p = pred.astype(jnp.float32)
    is_pos = target.astype(jnp.int32) == 1
    p_t = jnp.where(is_pos, p, 1.0 - p)
    p_t = jnp.clip(p_t, 0.0001, 1.0)
    a_t = jnp.where(is_pos, ALPHA, 1.0 - ALPHA)
    return (-a_t * (1.0 - p_t) ** GAMMA * jnp.log(p_t)).astype(pred.dtype)


if __name__ == "__main__":
    key = jax.random.PRNGKey(0)
    k = jax.random.split(key, 6)

    cases = []

    # 1) tiny aligned (batch, num_labels): flatten path, single block.
    B, L = 8, 16
    pred = jax.random.uniform(k[0], (B, L), dtype=jnp.float32)
    target = (jax.random.uniform(k[1], (B, L)) > 0.5).astype(jnp.float32)
    cases.append((pred, target))

    # 2) N divisible by 384 (not 1024): lane-dense free-view flatten + ragged
    #    last row-block; target streamed at int8 (narrow HBM stream).
    B, L = 64, 300
    pred = jax.random.uniform(k[2], (B, L), dtype=jnp.float32)
    target = (jax.random.uniform(k[3], (B, L)) > 0.5).astype(jnp.int8)
    cases.append((pred, target))

    # 3) N not a multiple of 128: native (B, L) layout, full-extent last dim,
    #    masked edge stores — no wrapper pad/slice copies.
    B, L = 63, 300
    pred = jax.random.uniform(k[4], (B, L), dtype=jnp.float32)
    target = (jax.random.uniform(k[5], (B, L)) > 0.5).astype(jnp.float32)
    cases.append((pred, target))

    for pred, target in cases:
        out = jax.block_until_ready(focal_loss_multilabel(pred, target))
        ref = focal_loss_multilabel_ref(pred, target)
        assert out.shape == pred.shape
        assert out.dtype == pred.dtype
        assert jnp.allclose(out, ref, atol=1e-5, rtol=1e-5)

    print("KERNEL_OK")
</pallas_src>

<mosaic_0001>
module attributes {stable_mosaic.version = 11 : i64} {
  func.func @focal_multilabel_kernel(%arg0: i32, %arg1: memref<1x128xf32, #tpu.memory_space<vmem>>, %arg2: memref<1x128xf32, #tpu.memory_space<vmem>>, %arg3: memref<1x128xf32, #tpu.memory_space<vmem>>) attributes {dimension_semantics = [#tpu.dimension_semantics<parallel>], iteration_bounds = array<i64: 1>, scalar_prefetch = 0 : i64, scratch_operands = 0 : i64, tpu.core_type = #tpu.core_type<tc>, window_params = [{transform_indices = @transform_0, window_bounds = array<i64: 1, 128>}, {transform_indices = @transform_1, window_bounds = array<i64: 1, 128>}, {transform_indices = @transform_2, window_bounds = array<i64: 1, 128>}]} {
    %c0 = arith.constant 0 : index
    %c0_0 = arith.constant 0 : index
    %0 = vector.load %arg1[%c0, %c0_0] : memref<1x128xf32, #tpu.memory_space<vmem>>, vector<1x128xf32>
    %c0_1 = arith.constant 0 : index
    %c0_2 = arith.constant 0 : index
    %1 = vector.load %arg2[%c0_1, %c0_2] : memref<1x128xf32, #tpu.memory_space<vmem>>, vector<1x128xf32>
    %2 = arith.fptosi %1 : vector<1x128xf32> to vector<1x128xi32>
    %c1_i32 = arith.constant 1 : i32
    %3 = vector.broadcast %c1_i32 : i32 to vector<1x128xi32>
    %4 = arith.cmpi eq, %2, %3 : vector<1x128xi32>
    %cst = arith.constant 1.000000e+00 : f32
    %5 = vector.broadcast %cst : f32 to vector<1x128xf32>
    %6 = arith.subf %5, %0 : vector<1x128xf32>
    %7 = arith.select %4, %0, %6 : vector<1x128xi1>, vector<1x128xf32>
    %cst_3 = arith.constant 9.99999974E-5 : f32
    %cst_4 = arith.constant 1.000000e+00 : f32
    %8 = vector.broadcast %cst_3 : f32 to vector<1x128xf32>
    %9 = arith.maximumf %8, %7 : vector<1x128xf32>
    %10 = vector.broadcast %cst_4 : f32 to vector<1x128xf32>
    %11 = arith.minimumf %10, %9 : vector<1x128xf32>
    %12 = math.log %11 : vector<1x128xf32>
    %cst_5 = arith.constant 2.500000e-01 : f32
    %cst_6 = arith.constant 7.500000e-01 : f32
    %13 = vector.broadcast %cst_5 : f32 to vector<1x128xf32>
    %14 = vector.broadcast %cst_6 : f32 to vector<1x128xf32>
    %15 = arith.select %4, %13, %14 : vector<1x128xi1>, vector<1x128xf32>
    %cst_7 = arith.constant 1.000000e+00 : f32
    %16 = vector.broadcast %cst_7 : f32 to vector<1x128xf32>
    %17 = arith.subf %16, %11 : vector<1x128xf32>
    %18 = arith.mulf %17, %17 : vector<1x128xf32>
    %cst_8 = arith.constant 0.000000e+00 : f32
    %19 = vector.broadcast %cst_8 : f32 to vector<1x128xf32>
    %20 = arith.subf %19, %15 : vector<1x128xf32>
    %21 = arith.mulf %20, %18 : vector<1x128xf32>
    %22 = arith.mulf %21, %12 : vector<1x128xf32>
    %c0_9 = arith.constant 0 : index
    %c0_10 = arith.constant 0 : index
    %23 = vector.load %arg3[%c0_9, %c0_10] : memref<1x128xf32, #tpu.memory_space<vmem>>, vector<1x128xf32>
    tpu.vector_store %arg3[%c0_9, %c0_10], %22 {strides = array<i32>} : memref<1x128xf32, #tpu.memory_space<vmem>>, vector<1x128xf32>,
    return
  }
  func.func @transform_0(%arg0: i32) -> (i32, i32) {
    %c0_i32 = arith.constant 0 : i32
    %c0_i32_0 = arith.constant 0 : i32
    return %arg0, %c0_i32 : i32, i32
  }
  func.func @transform_1(%arg0: i32) -> (i32, i32) {
    %c0_i32 = arith.constant 0 : i32
    %c0_i32_0 = arith.constant 0 : i32
    return %arg0, %c0_i32 : i32, i32
  }
  func.func @transform_2(%arg0: i32) -> (i32, i32) {
    %c0_i32 = arith.constant 0 : i32
    %c0_i32_0 = arith.constant 0 : i32
    return %arg0, %c0_i32 : i32, i32
  }
}

</mosaic_0001>

<bundles_post_ra>
// kernel: tpu_custom_call.1
= control target key start
LH: loop header
LB: loop body
LE: loop exit
PB: predicated region body
PF: predicated region fallthrough
CT: control target
= control target key end

     0   :  { %7 = vsyncpa [#allocation3], 0  ;;  %s134_s0 = inlined_call_operand.hbm [shape: f32[1,128], index: 0, kind: input, shape index: {}]   ;;  %s135_s1 = inlined_call_operand.vmem [shape: f32[1,128], index: 1, kind: input, shape index: {}]   ;;  %s136_s2 = inlined_call_operand.hbm [shape: f32[1,128], index: 2, kind: output, shape index: {}]  }
   0x1   :  { %8 = vsyncpa [#allocation4], 0  ;;  %s107_s9 = smov [#allocation2]  }
   0x2   :  { %s15_s10 = sshll.u32 %s107_s9, 4  ;;  %s16_s10 = int_to_ptr.vmem [resolvable:$true] %s15_s10 }
   0x3   :  { %s71_s11 = scalar_lea.vmem %s16_s10, 16  ;;  %s75_s12 = scalar_lea.vmem %s16_s10, 32 }
   0x4   :  { %p72_p0 = scmp.ne.s32.totalorder %s16_s10, %s71_s11  ;;  %p76_p1 = scmp.lt.s32.totalorder %s16_s10, %s16_s10 }
   0x5   :  { %p77_p2 = scmp.lt.s32.totalorder %s75_s12, %s71_s11 }
   0x7   :  { %p78_p3 = por %p77_p2, %p76_p1 }
   0x9   :  { %p79_p4 = pnand %p78_p3, %p72_p0 }
   0xb   :  { %82 = shalt.err (!%p79_p4)
}
   0xc   :  { %18 = dma.hbm_to_vmem [thread:$0]  %s134_s0, 16, %s16_s10, [#allocation3]  }
   0xd   :  { %103 = dma.done.wait [#allocation3], 16  }
   0xe   :  { %104 = vsyncadd [#allocation3], 4294967280  ;;  %v24_v0 = vld [vmem:[#allocation2] sm:$0x1]  ;;  %v108_v9 = vmov 0.75   ;;  %s109_s0 = smov [#allocation5]  }
   0xf   :  { %v25_v1 = vld [vmem:[%s135_s1] sm:$0x1]  ;;  %v28_v3 = vsub.f32 1.0, %v24_v0  ;;  %s47_s17 = sshll.u32 %s109_s0, 4  ;;  %s48_s17 = int_to_ptr.vmem [resolvable:$true] %s47_s17 }
  0x10   :  { %v56_v2 = vtrunc.f32 %v25_v1  ;;  %s83_s1 = scalar_lea.vmem %s48_s17, 16  ;;  %s87_s18 = scalar_lea.vmem %s48_s17, 32 }
  0x11   :  { %p84_p5 = scmp.ne.s32.totalorder %s48_s17, %s83_s1  ;;  %p88_p6 = scmp.lt.s32.totalorder %s48_s17, %s48_s17 }
  0x12   :  { %v57_v4 = vcvt.f32.s32 %v56_v2  ;;  %p89_p7 = scmp.lt.s32.totalorder %s87_s18, %s83_s1 }
  0x14   :  { %vm27_vm0 = vcmp.eq.s32.totalorder %v57_v4, 1  ;;  %p90_p8 = por %p89_p7, %p88_p6 }
  0x15   :  { %v29_v5 = vsel %vm27_vm0, %v24_v0, %v28_v3  ;;  %v34_v10 = vsel %vm27_vm0, 0.25, %v108_v9 }
  0x16   :  { %v30_v6 = vmax.f32 %v29_v5, 0.0001  ;;  %v37_v12 = vsub.f32 0.0, %v34_v10  ;;  %p91_p9 = pnand %p90_p8, %p84_p5 }
  0x18   :  { %v31_v7 = vmin.f32 %v30_v6, 1.0 }
  0x1a   :  { %61 = vlog2.f32 %v31_v7  ;;  %v35_v8 = vsub.f32 1.0, %v31_v7 }
  0x1c   :  { %v36_v11 = vmul.f32 %v35_v8, %v35_v8 }
  0x1e   :  { %v38_v13 = vmul.f32 %v37_v12, %v36_v11 }
  0x27   :  { %v62_v14 = vpop.eup %61 }
  0x28   :  { %v33_v15 = vmul.f32 0.6931472, %v62_v14 }
  0x2a   :  { %v39_v16 = vmul.f32 %v38_v13, %v33_v15 }
  0x2c   :  { %40 = vst [vmem:[#allocation5] sm:$0x1] %v39_v16 }
  0x2d   :  { %94 = shalt.err (!%p91_p9)
}
  0x2e   :  { %50 = dma.vmem_to_hbm [thread:$0]  %s48_s17, 16, %s136_s2, [#allocation4]  }
  0x2f   :  { %105 = dma.done.wait [#allocation4], 16  }
  0x30   :  { %106 = vsyncadd [#allocation4], 4294967280 }
  0x31   :  { %54 = vsyncpa [#allocation3], 1 }
  0x32   :  { %55 = vsyncpa [#allocation4], 1 }

</bundles_post_ra>
